<compile_context>
chip_gen: v5e
topology: v5e:2x2
jax: 0.10.0
libtpu: 0.0.40
codegen_flags: <defaults>
</compile_context>

<pallas_src>
import functools

import jax
import jax.numpy as jnp
from jax.experimental import pallas as pl
from jax.experimental.pallas import tpu as pltpu


def _round_up(x, m):
    return (x + m - 1) // m * m


# ----------------------------------------------------------------------------
# Fused kernel
#   A    : [B, HWp, Kp]   bf16  (im2col patches, spatial rows tiled by block_m)
#   Wc   : [Kp, Coutp]    bf16  (conv weight)
#   bc   : [1, Coutp]     f32   (conv bias)
#   Wcls : [Coutp, NCp]   f32   (classifier weight)
#   bcls : [1, NCp]       f32   (classifier bias)
#   out  : [B, 1, NCp]    f32   (logits, padded lanes)
# ----------------------------------------------------------------------------
def _fused_kernel(a_ref, wc_ref, bc_ref, wh_ref, bh_ref, o_ref, acc_ref,
                  *, hw_valid, inv_hw):
    i = pl.program_id(1)
    n_m = pl.num_programs(1)
    block_m = a_ref.shape[1]

    @pl.when(i == 0)
    def _init():
        acc_ref[...] = jnp.zeros_like(acc_ref)

    # conv-as-matmul on the MXU: bf16 inputs, f32 accumulation.
    a = a_ref[0]                                            # (block_m, Kp)
    conv = jnp.dot(a, wc_ref[...], preferred_element_type=jnp.float32)
    conv = jnp.maximum(conv + bc_ref[...], 0.0)             # bias + ReLU (f32)

    # Mask spatial-padding rows so relu(bias) on zero-padded patch rows does
    # not pollute the pooled mean.
    row = jax.lax.broadcasted_iota(jnp.int32, (block_m, 1), 0) + i * block_m
    conv = jnp.where(row < hw_valid, conv, 0.0)

    # Global-average-pool accumulation (per-tile sublane reduction, f32).
    acc_ref[...] += jnp.sum(conv, axis=0, keepdims=True)    # (1, Coutp)

    @pl.when(i == n_m - 1)
    def _finalize():
        pooled = acc_ref[...] * inv_hw                      # mean over H*W
        logits = jnp.dot(pooled, wh_ref[...],
                         preferred_element_type=jnp.float32) + bh_ref[...]
        o_ref[...] = logits.reshape(o_ref.shape)


def fused_conv_gap_head(patches_p, w_conv_p, b_conv_p, w_cls_p, b_cls_p,
                        *, hw_valid, block_m):
    B, HWp, Kp = patches_p.shape
    _, Coutp = w_conv_p.shape
    _, NCp = w_cls_p.shape
    assert HWp % block_m == 0 and block_m % 8 == 0
    n_m = HWp // block_m

    kernel = functools.partial(_fused_kernel, hw_valid=hw_valid,
                               inv_hw=1.0 / float(hw_valid))

    cost = pl.CostEstimate(
        flops=2 * B * HWp * Kp * Coutp + 2 * B * Coutp * NCp,
        transcendentals=0,
        bytes_accessed=int(patches_p.size * 2 + w_conv_p.size * 2
                           + (b_conv_p.size + w_cls_p.size + b_cls_p.size) * 4
                           + B * NCp * 4))

    out = pl.pallas_call(
        kernel,
        out_shape=jax.ShapeDtypeStruct((B, 1, NCp), jnp.float32),
        grid_spec=pltpu.PrefetchScalarGridSpec(
            num_scalar_prefetch=0,
            grid=(B, n_m),
            in_specs=[
                pl.BlockSpec((1, block_m, Kp), lambda b, i: (b, i, 0)),
                pl.BlockSpec((Kp, Coutp), lambda b, i: (0, 0)),
                pl.BlockSpec((1, Coutp), lambda b, i: (0, 0)),
                pl.BlockSpec((Coutp, NCp), lambda b, i: (0, 0)),
                pl.BlockSpec((1, NCp), lambda b, i: (0, 0)),
            ],
            out_specs=pl.BlockSpec((1, 1, NCp), lambda b, i: (b, 0, 0)),
            scratch_shapes=[pltpu.VMEM((1, Coutp), jnp.float32)],
        ),
        compiler_params=pltpu.CompilerParams(
            dimension_semantics=("parallel", "arbitrary")),
        cost_estimate=cost,
    )(patches_p, w_conv_p, b_conv_p, w_cls_p, b_cls_p)
    return out[:, 0, :]


# ----------------------------------------------------------------------------
# Glue: im2col patch extraction (pure indexing / reshape, no compute)
# ----------------------------------------------------------------------------
def im2col_3x3(x_nhwc):
    B, H, W, C = x_nhwc.shape
    xp = jnp.pad(x_nhwc, ((0, 0), (1, 1), (1, 1), (0, 0)))
    taps = [xp[:, di:di + H, dj:dj + W, :]
            for di in range(3) for dj in range(3)]
    return jnp.concatenate(taps, axis=-1).reshape(B, H * W, 9 * C)


def network_forward(x_nchw, params, *, block_m=512):
    """Forward pass matching Network.forward: NCHW in -> [B, num_class] out."""
    B, Cin, H, W = x_nchw.shape
    HW = H * W
    x = jnp.transpose(x_nchw, (0, 2, 3, 1))                 # NCHW -> NHWC
    patches = im2col_3x3(x)                                 # [B, HW, 9*Cin]

    K = patches.shape[-1]
    Cout = params["w_conv"].shape[-1]
    NC = params["w_cls"].shape[-1]
    Kp = _round_up(K, 128)
    Coutp = _round_up(Cout, 128)
    NCp = _round_up(NC, 128)

    block_m = _round_up(min(block_m, _round_up(HW, 8)), 8)
    HWp = _round_up(HW, block_m)

    patches_p = jnp.pad(patches, ((0, 0), (0, HWp - HW), (0, Kp - K)))
    patches_p = patches_p.astype(jnp.bfloat16)
    w_conv_p = jnp.pad(params["w_conv"],
                       ((0, Kp - K), (0, Coutp - Cout))).astype(jnp.bfloat16)
    b_conv_p = jnp.pad(params["b_conv"], ((0, 0), (0, Coutp - Cout)))
    w_cls_p = jnp.pad(params["w_cls"], ((0, Coutp - Cout), (0, NCp - NC)))
    b_cls_p = jnp.pad(params["b_cls"], ((0, 0), (0, NCp - NC)))

    logits_p = fused_conv_gap_head(patches_p, w_conv_p, b_conv_p,
                                   w_cls_p, b_cls_p,
                                   hw_valid=HW, block_m=block_m)
    return logits_p[:, :NC]


def network_forward_ref(x_nchw, params):
    """Pure-JAX reference (same bf16 operand rounding as the kernel)."""
    x = jnp.transpose(x_nchw, (0, 2, 3, 1))
    patches = im2col_3x3(x)
    a = patches.astype(jnp.bfloat16).astype(jnp.float32)
    wc = params["w_conv"].astype(jnp.bfloat16).astype(jnp.float32)
    feat = jnp.maximum(jnp.einsum("bmk,kc->bmc", a, wc) + params["b_conv"], 0.0)
    pooled = feat.mean(axis=1)
    return pooled @ params["w_cls"] + params["b_cls"]


def init_params(key, cin=3, cout=32, num_class=10, k=3):
    k1, k2, k3, k4 = jax.random.split(key, 4)
    # conv weight stored as [k*k*Cin, Cout] matching im2col tap order (di,dj,cin)
    w_conv = jax.random.normal(k1, (k * k * cin, cout), jnp.float32) * 0.05
    b_conv = jax.random.normal(k2, (1, cout), jnp.float32) * 0.01
    w_cls = jax.random.normal(k3, (cout, num_class), jnp.float32) * 0.05
    b_cls = jax.random.normal(k4, (1, num_class), jnp.float32) * 0.01
    return {"w_conv": w_conv, "b_conv": b_conv, "w_cls": w_cls, "b_cls": b_cls}


if __name__ == "__main__":
    key = jax.random.PRNGKey(0)
    kx, kp = jax.random.split(key)

    B, Cin, H, W = 2, 4, 16, 16
    num_class = 10
    x = jax.random.normal(kx, (B, Cin, H, W), jnp.float32)   # NCHW like PyTorch
    params = init_params(kp, cin=Cin, cout=32, num_class=num_class)

    # block_m=96 deliberately does not divide H*W=256 so the grid runs 3 row
    # tiles per image and the padded-row masking / accumulator path is tested.
    fwd = jax.jit(functools.partial(network_forward, block_m=96))
    logits = fwd(x, params)
    jax.block_until_ready(logits)
    assert logits.shape == (B, num_class)

    ref = network_forward_ref(x, params)
    err = float(jnp.max(jnp.abs(logits - ref)))
    assert jnp.allclose(logits, ref, rtol=2e-2, atol=2e-2), err
    print("KERNEL_OK")
</pallas_src>

<mosaic_0001>
module attributes {stable_mosaic.version = 11 : i64} {
  func.func @_fused_kernel(%arg0: i32, %arg1: i32, %arg2: memref<1x96x128xbf16, #tpu.memory_space<vmem>>, %arg3: memref<128x128xbf16, #tpu.memory_space<vmem>>, %arg4: memref<1x128xf32, #tpu.memory_space<vmem>>, %arg5: memref<128x128xf32, #tpu.memory_space<vmem>>, %arg6: memref<1x128xf32, #tpu.memory_space<vmem>>, %arg7: memref<1x1x128xf32, #tpu.memory_space<vmem>>, %arg8: memref<1x128xf32, #tpu.memory_space<vmem>>) attributes {dimension_semantics = [#tpu.dimension_semantics<parallel>, #tpu.dimension_semantics<arbitrary>], iteration_bounds = array<i64: 2, 3>, scalar_prefetch = 0 : i64, scratch_operands = 1 : i64, tpu.core_type = #tpu.core_type<tc>, window_params = [{transform_indices = @transform_0, window_bounds = array<i64: 1, 96, 128>}, {pipeline_mode = #tpu.pipeline_mode<synchronous>, transform_indices = @transform_1, window_bounds = array<i64: 128, 128>}, {pipeline_mode = #tpu.pipeline_mode<synchronous>, transform_indices = @transform_2, window_bounds = array<i64: 1, 128>}, {pipeline_mode = #tpu.pipeline_mode<synchronous>, transform_indices = @transform_3, window_bounds = array<i64: 128, 128>}, {pipeline_mode = #tpu.pipeline_mode<synchronous>, transform_indices = @transform_4, window_bounds = array<i64: 1, 128>}, {transform_indices = @transform_5, window_bounds = array<i64: 1, 1, 128>}]} {
    %c0_i32 = arith.constant 0 : i32
    %0 = arith.cmpi eq, %arg1, %c0_i32 : i32
    %1 = arith.extui %0 : i1 to i32
    %c0_i32_0 = arith.constant 0 : i32
    %2 = arith.cmpi ne, %1, %c0_i32_0 : i32
    scf.if %2 {
      %cst_15 = arith.constant 0.000000e+00 : f32
      %30 = vector.broadcast %cst_15 : f32 to vector<1x128xf32>
      %c0_16 = arith.constant 0 : index
      %c0_17 = arith.constant 0 : index
      %31 = vector.load %arg8[%c0_16, %c0_17] : memref<1x128xf32, #tpu.memory_space<vmem>>, vector<1x128xf32>
      tpu.vector_store %arg8[%c0_16, %c0_17], %30 {strides = array<i32>} : memref<1x128xf32, #tpu.memory_space<vmem>>, vector<1x128xf32>,
    } else {
    }
    %c0 = arith.constant 0 : index
    %c0_1 = arith.constant 0 : index
    %c0_2 = arith.constant 0 : index
    %3 = vector.load %arg2[%c0, %c0_1, %c0_2] : memref<1x96x128xbf16, #tpu.memory_space<vmem>>, vector<1x96x128xbf16>
    %4 = vector.shape_cast %3 : vector<1x96x128xbf16> to vector<96x128xbf16>
    %c0_3 = arith.constant 0 : index
    %c0_4 = arith.constant 0 : index
    %5 = vector.load %arg3[%c0_3, %c0_4] : memref<128x128xbf16, #tpu.memory_space<vmem>>, vector<128x128xbf16>
    %cst = arith.constant dense<0.000000e+00> : vector<96x128xf32>
    %6 = tpu.matmul %4, %5, %cst {dimension_numbers = #tpu.dot_dimension_numbers<[1], [0], [0], [1], [0, 0, 1, 1], [], []>} : vector<96x128xbf16>, vector<128x128xbf16>, vector<96x128xf32> -> vector<96x128xf32>
    %c0_5 = arith.constant 0 : index
    %c0_6 = arith.constant 0 : index
    %7 = vector.load %arg4[%c0_5, %c0_6] : memref<1x128xf32, #tpu.memory_space<vmem>>, vector<1x128xf32>
    %8 = vector.broadcast %7 : vector<1x128xf32> to vector<96x128xf32>
    %9 = arith.addf %6, %8 : vector<96x128xf32>
    %cst_7 = arith.constant 0.000000e+00 : f32
    %10 = vector.broadcast %cst_7 : f32 to vector<96x128xf32>
    %11 = arith.maximumf %9, %10 : vector<96x128xf32>
    %12 = tpu.iota {dimensions = array<i32: 0>} : vector<96x1xi32>
    %c96_i32 = arith.constant 96 : i32
    %13 = arith.muli %arg1, %c96_i32 : i32
    %14 = vector.broadcast %13 : i32 to vector<96x1xi32>
    %15 = arith.addi %12, %14 : vector<96x1xi32>
    %c256_i32 = arith.constant 256 : i32
    %16 = vector.broadcast %c256_i32 : i32 to vector<96x1xi32>
    %17 = arith.cmpi slt, %15, %16 : vector<96x1xi32>
    %cst_8 = arith.constant 0.000000e+00 : f32
    %18 = vector.shape_cast %17 : vector<96x1xi1> to vector<96x1xi1>
    %19 = vector.broadcast %18 : vector<96x1xi1> to vector<96x128xi1>
    %20 = vector.broadcast %cst_8 : f32 to vector<96x128xf32>
    %21 = arith.select %19, %11, %20 : vector<96x128xi1>, vector<96x128xf32>
    %c0_9 = arith.constant 0 : index
    %c0_10 = arith.constant 0 : index
    %22 = vector.load %arg8[%c0_9, %c0_10] : memref<1x128xf32, #tpu.memory_space<vmem>>, vector<1x128xf32>
    %cst_11 = arith.constant dense<0.000000e+00> : vector<128xf32>
    %23 = vector.multi_reduction <add>, %21, %cst_11 [0] : vector<96x128xf32> to vector<128xf32>
    %24 = vector.shape_cast %23 : vector<128xf32> to vector<1x128xf32>
    %25 = arith.addf %22, %24 : vector<1x128xf32>
    %c0_12 = arith.constant 0 : index
    %c0_13 = arith.constant 0 : index
    %26 = vector.load %arg8[%c0_12, %c0_13] : memref<1x128xf32, #tpu.memory_space<vmem>>, vector<1x128xf32>
    tpu.vector_store %arg8[%c0_12, %c0_13], %25 {strides = array<i32>} : memref<1x128xf32, #tpu.memory_space<vmem>>, vector<1x128xf32>,
    %c2_i32 = arith.constant 2 : i32
    %27 = arith.cmpi eq, %arg1, %c2_i32 : i32
    %28 = arith.extui %27 : i1 to i32
    %c0_i32_14 = arith.constant 0 : i32
    %29 = arith.cmpi ne, %28, %c0_i32_14 : i32
    scf.if %29 {
      %c0_15 = arith.constant 0 : index
      %c0_16 = arith.constant 0 : index
      %30 = vector.load %arg8[%c0_15, %c0_16] : memref<1x128xf32, #tpu.memory_space<vmem>>, vector<1x128xf32>
      %cst_17 = arith.constant 3.906250e-03 : f32
      %31 = vector.broadcast %cst_17 : f32 to vector<1x128xf32>
      %32 = arith.mulf %30, %31 : vector<1x128xf32>
      %c0_18 = arith.constant 0 : index
      %c0_19 = arith.constant 0 : index
      %33 = vector.load %arg5[%c0_18, %c0_19] : memref<128x128xf32, #tpu.memory_space<vmem>>, vector<128x128xf32>
      %cst_20 = arith.constant dense<0.000000e+00> : vector<1x128xf32>
      %34 = tpu.matmul %32, %33, %cst_20 {dimension_numbers = #tpu.dot_dimension_numbers<[1], [0], [0], [1], [0, 0, 1, 1], [], []>} : vector<1x128xf32>, vector<128x128xf32>, vector<1x128xf32> -> vector<1x128xf32>
      %c0_21 = arith.constant 0 : index
      %c0_22 = arith.constant 0 : index
      %35 = vector.load %arg6[%c0_21, %c0_22] : memref<1x128xf32, #tpu.memory_space<vmem>>, vector<1x128xf32>
      %36 = arith.addf %34, %35 : vector<1x128xf32>
      %37 = vector.shape_cast %36 : vector<1x128xf32> to vector<1x1x128xf32>
      %c0_23 = arith.constant 0 : index
      %c0_24 = arith.constant 0 : index
      %c0_25 = arith.constant 0 : index
      %38 = vector.load %arg7[%c0_23, %c0_24, %c0_25] : memref<1x1x128xf32, #tpu.memory_space<vmem>>, vector<1x1x128xf32>
      tpu.vector_store %arg7[%c0_23, %c0_24, %c0_25], %37 {strides = array<i32>} : memref<1x1x128xf32, #tpu.memory_space<vmem>>, vector<1x1x128xf32>,
    } else {
    }
    return
  }
  func.func @transform_0(%arg0: i32, %arg1: i32) -> (i32, i32, i32) {
    %c0_i32 = arith.constant 0 : i32
    %c0_i32_0 = arith.constant 0 : i32
    return %arg0, %arg1, %c0_i32 : i32, i32, i32
  }
  func.func @transform_1(%arg0: i32, %arg1: i32) -> (i32, i32) {
    %c0_i32 = arith.constant 0 : i32
    %c0_i32_0 = arith.constant 0 : i32
    %c0_i32_1 = arith.constant 0 : i32
    return %c0_i32, %c0_i32_0 : i32, i32
  }
  func.func @transform_2(%arg0: i32, %arg1: i32) -> (i32, i32) {
    %c0_i32 = arith.constant 0 : i32
    %c0_i32_0 = arith.constant 0 : i32
    %c0_i32_1 = arith.constant 0 : i32
    return %c0_i32, %c0_i32_0 : i32, i32
  }
  func.func @transform_3(%arg0: i32, %arg1: i32) -> (i32, i32) {
    %c0_i32 = arith.constant 0 : i32
    %c0_i32_0 = arith.constant 0 : i32
    %c0_i32_1 = arith.constant 0 : i32
    return %c0_i32, %c0_i32_0 : i32, i32
  }
  func.func @transform_4(%arg0: i32, %arg1: i32) -> (i32, i32) {
    %c0_i32 = arith.constant 0 : i32
    %c0_i32_0 = arith.constant 0 : i32
    %c0_i32_1 = arith.constant 0 : i32
    return %c0_i32, %c0_i32_0 : i32, i32
  }
  func.func @transform_5(%arg0: i32, %arg1: i32) -> (i32, i32, i32) {
    %c0_i32 = arith.constant 0 : i32
    %c0_i32_0 = arith.constant 0 : i32
    %c0_i32_1 = arith.constant 0 : i32
    return %arg0, %c0_i32, %c0_i32_0 : i32, i32, i32
  }
}

</mosaic_0001>

<bundles_post_ra>
// kernel: network_forward.1
= control target key start
LH: loop header
LB: loop body
LE: loop exit
PB: predicated region body
PF: predicated region fallthrough
CT: control target
= control target key end

     0   :  { %10 = vsyncpa [#allocation4], 0  ;;  %s1208_s0 = inlined_call_operand.vmem [shape: bf16[2,288,128], index: 0, kind: input, shape index: {}]   ;;  %s1209_s1 = inlined_call_operand.vmem [shape: bf16[128,128], index: 1, kind: input, shape index: {}]   ;;  %s1210_s2 = inlined_call_operand.vmem [shape: f32[1,128], index: 2, kind: input, shape index: {}]   ;;  %s1211_s3 = inlined_call_operand.vmem [shape: f32[128,128], index: 3, kind: input, shape index: {}]   ;;  %s1212_s4 = inlined_call_operand.vmem [shape: f32[1,128], index: 4, kind: input, shape index: {}]   ;;  %s1213_s5 = inlined_call_operand.hbm [shape: f32[2,1,128], index: 5, kind: output, shape index: {}]  }
   0x1   :  { %12 = vsyncpa [#allocation4 + $0x1], 0  ;;  %s951_s18 = smov 0   ;;  %s953_s19 = smov 0  }
   0x2   :  { %s955_s20 = smov 0   ;;  %s957_s21 = smov 0  }
   0x3   :  { %s959_s22 = smov 0   ;;  %s961_s23 = smov 0  }
   0x4   :  { %s963_s24 = smov 0   ;;  %s965_s25 = smov 0  }
   0x5 LB: > { %s646_s26 = sadd.s32 4294967295, %s918_s25   ;;  %s647_s27 = sadd.s32 4294967294, %s918_s25   ;;  %s918_s25 = sphi %s965_s25, %s18_s25   ;;  %s914_s24 = sphi %s963_s24, %s1222_s24   ;;  %s910_s23 = sphi %s961_s23, %s1221_s23   ;;  %s906_s22 = sphi %s959_s22, %s1220_s22   ;;  %s902_s21 = sphi %s957_s21, %s1219_s21   ;;  %s898_s20 = sphi %s955_s20, %s1218_s20   ;;  %s894_s19 = sphi %s953_s19, %s1217_s19   ;;  %s890_s18 = sphi %s951_s18, %s1216_s18  }
   0x6   : > { %s27_s28 = sadd.s32 1, %s910_s23  ;;  %s30_s29 = sadd.s32 1, %s914_s24 }
   0x7   : > { %p28_p0 = scmp.ge.s32.totalorder %s27_s28, 3  ;;  %p159_p1 = scmp.ne.s32.totalorder %s898_s20, %s894_s19 }
   0x8   : > { %p160_p2 = scmp.eq.s32.totalorder %s646_s26, 5  ;;  %p165_p4 = scmp.ne.s32.totalorder %s894_s19, %s890_s18 }
   0x9   : > { %s1224_s28 = smov (%p28_p0, %s27_s28), 0  ;;  %s1226_s29 = smov (!%p28_p0, %s30_s29), %s914_s24 }
   0xa   : > { %p1000_p3 = por %p160_p2, %p159_p1  ;;  %p32_p5 = scmp.ge.s32.totalorder %s1226_s29, 2 }
   0xb   : > { %p166_p6 = scmp.eq.s32.totalorder %s647_s27, 5  ;;  %p650_p7 = scmp.ge.s32.totalorder %s918_s25, 1 }
   0xc   : > { %p209_p8 = scmp.lt.s32.totalorder %s918_s25, 7  ;;  %s1228_s29 = smov (%p32_p5, %s1226_s29), 0 }
   0xd   : > { %p1010_p9 = por %p166_p6, %p165_p4  ;;  %s146_s7 = ssub.s32 %s914_s24, %s1228_s29 }
   0xe   : > { %p210_p10 = pnand %p650_p7, %p209_p8  ;;  %s149_s8 = sadd.s32 1, %s898_s20 }
   0xf   : > { %p147_p11 = scmp.eq.s32.totalorder %s146_s7, 0  ;;  %s238_s10 = sand.u32 (!%p210_p10), 1, %s894_s19  }
  0x10   : > { %213 = sbr.rel (%p210_p10) target bundleno = 424 (0x1a8), region = 40  ;;  %p241_p12 = scmp.lt.s32.totalorder (!%p210_p10), %s906_s22, 1 }
  0x11   : > { %s1018_s9 = scalar_select %p147_p11, %s898_s20, %s149_s8  }
  0x12   : > { %s240_s11 = smul.u32 (!%p210_p10), 12, %s902_s21  ;;  %s1031_s27 = scalar_lea.vmem (!%p210_p10), [#allocation3], %s238_s10 }
  0x13   : > { %p652_p0 = scmp.ne.s32.totalorder (!%p210_p10), %s902_s21, 0 }
  0x14   : > { %p243_p13 = scmp.lt.s32.totalorder (!%p210_p10), %s240_s11, 35 }
  0x15   : > { %s242_s12 = scalar_select %p241_p12, %s906_s22, 1 }
  0x16   : > { %s1230_s11 = smov (!%p243_p13, %s240_s11), 35 }
  0x17   : > { %s750_s13 = smul.u32 36, %s242_s12 }
  0x18   : > { %253 = sbr.rel (%p652_p0) target bundleno = 31 (0x1f), region = 44 }
  0x19   : > { %s246_s14 = sadd.s32 %s750_s13, %s1230_s11 }
  0x1a   : > { %s651_s15 = sshll.u32 %s246_s14, 2 }
  0x1b   : > { %s1027_s26 = scalar_lea.vmem %s1208_s0, %s651_s15 }
  0x1d   : > { %v920_v0 = vmov 0.0  }
  0x1e   : > { %254 = vst [vmem:[#allocation2] sm:$0x1] %v920_v0 }
  0x1f PF: > { %v725_v1 = vld [vmem:[%s1209_s1 + $0x38] sm:$0xff]  ;;  %v724_v2 = vld [vmem:[%s1209_s1 + $0x30] sm:$0xff]  ;;  %v723_v3 = vld [vmem:[%s1209_s1 + $0x28] sm:$0xff]  ;;  %v422_v15 = vlaneseq  ;;  %s435_s16 = smul.u32 96, %s902_s21  ;;  %p709_p1 = scmp.ne.s32.totalorder %s902_s21, 2 }
  0x20   : > { %371 = vmatpush.bf16.msra.mxu0 %v725_v1  ;;  %727 = vmatpush.bf16.msra.mxu2 %v725_v1  ;;  %v722_v4 = vld [vmem:[%s1209_s1 + $0x20] sm:$0xff]  ;;  %v721_v5 = vld [vmem:[%s1209_s1 + $0x18] sm:$0xff]  ;;  %v720_v6 = vld [vmem:[%s1209_s1 + $0x10] sm:$0xff] }
  0x21   : > { %728 = vmatpush.bf16.msra.mxu3 %v725_v1  ;;  %726 = vmatpush.bf16.msra.mxu1 %v725_v1  ;;  %v719_v7 = vld [vmem:[%s1209_s1 + $0x8] sm:$0xff]  ;;  %v718_v8 = vld [vmem:[%s1209_s1] sm:$0xff]  ;;  %v714_v10 = vld [vmem:[%s1027_s26 + $0x10] sm:$0xff]  ;;  %v1064_v17 = vshrl.u32 %v422_v15, 7  ;;  %v1074_v22 = vstv %s435_s16 }
  0x22   : > { %v712_v9 = vld [vmem:[%s1027_s26] sm:$0xff]  ;;  %v713_v12 = vld [vmem:[%s1027_s26 + $0x8] sm:$0xff]  ;;  %v715_v13 = vld [vmem:[%s1027_s26 + $0x18] sm:$0xff] }
  0x23   : > { %v716_v11 = vld [vmem:[%s1027_s26 + $0x20] sm:$0xff]  ;;  %v717_v14 = vld [vmem:[%s1027_s26 + $0x28] sm:$0xff]  ;;  %v424_v19 = vadd.s32 8, %v1064_v17  ;;  %v437_v23 = vadd.s32 %v1074_v22, %v1064_v17  ;;  %v425_v24 = vadd.s32 16, %v1064_v17  ;;  %v426_v34 = vadd.s32 24, %v1064_v17 }
  0x24   : > { %372 = vmatpush.bf16.msra.mxu0 %v724_v2  ;;  %730 = vmatpush.bf16.msra.mxu2 %v724_v2  ;;  %v1071_v20 = vld [vmem:[%s1210_s2] ss:$0 sm:$0xff]  ;;  %v427_v42 = vadd.s32 32, %v1064_v17  ;;  %v428_v50 = vadd.s32 40, %v1064_v17  ;;  %v429_v51 = vadd.s32 48, %v1064_v17  ;;  %v430_v61 = vadd.s32 56, %v1064_v17 }
  0x25   : > { %731 = vmatpush.bf16.msra.mxu3 %v724_v2  ;;  %729 = vmatpush.bf16.msra.mxu1 %v724_v2  ;;  %v438_v26 = vadd.s32 %v1074_v22, %v424_v19  ;;  %vm449_vm0 = vcmp.lt.s32.totalorder %v437_v23, 256  ;;  %v439_v32 = vadd.s32 %v1074_v22, %v425_v24  ;;  %v440_v40 = vadd.s32 %v1074_v22, %v426_v34 }
  0x26   : > { %v441_v48 = vadd.s32 %v1074_v22, %v427_v42  ;;  %v442_v59 = vadd.s32 %v1074_v22, %v428_v50  ;;  %v443_v60 = vadd.s32 %v1074_v22, %v429_v51  ;;  %v431_v62 = vadd.s32 64, %v1064_v17 }
  0x27   : > { %vm450_vm1 = vcmp.lt.s32.totalorder %v438_v26, 256  ;;  %vm451_vm2 = vcmp.lt.s32.totalorder %v439_v32, 256  ;;  %vm452_vm3 = vcmp.lt.s32.totalorder %v440_v40, 256  ;;  %v432_v1 = vadd.s32 72, %v1064_v17 }
  0x28   : > { %373 = vmatpush.bf16.msra.mxu0 %v723_v3  ;;  %733 = vmatpush.bf16.msra.mxu2 %v723_v3  ;;  %vm453_vm4 = vcmp.lt.s32.totalorder %v441_v48, 256  ;;  %vm454_vm5 = vcmp.lt.s32.totalorder %v442_v59, 256  ;;  %vm455_vm6 = vcmp.lt.s32.totalorder %v443_v60, 256 }
  0x29   : > { %734 = vmatpush.bf16.msra.mxu3 %v723_v3  ;;  %732 = vmatpush.bf16.msra.mxu1 %v723_v3 }
  0x2c   : > { %374 = vmatpush.bf16.msra.mxu0 %v722_v4  ;;  %736 = vmatpush.bf16.msra.mxu2 %v722_v4 }
  0x2d   : > { %737 = vmatpush.bf16.msra.mxu3 %v722_v4  ;;  %735 = vmatpush.bf16.msra.mxu1 %v722_v4  ;;  %v444_v4 = vadd.s32 %v1074_v22, %v430_v61 }
  0x2f   : > { %vm456_vm7 = vcmp.lt.s32.totalorder %v444_v4, 256 }
  0x30   : > { %375 = vmatpush.bf16.msra.mxu0 %v721_v5  ;;  %739 = vmatpush.bf16.msra.mxu2 %v721_v5 }
  0x31   : > { %740 = vmatpush.bf16.msra.mxu3 %v721_v5  ;;  %738 = vmatpush.bf16.msra.mxu1 %v721_v5 }
  0x34   : > { %376 = vmatpush.bf16.msra.mxu0 %v720_v6  ;;  %742 = vmatpush.bf16.msra.mxu2 %v720_v6 }
  0x35   : > { %743 = vmatpush.bf16.msra.mxu3 %v720_v6  ;;  %741 = vmatpush.bf16.msra.mxu1 %v720_v6  ;;  %v445_v6 = vadd.s32 %v1074_v22, %v431_v62 }
  0x37   : > { %vm457_vm8 = vcmp.lt.s32.totalorder %v445_v6, 256 }
  0x38   : > { %377 = vmatpush.bf16.msra.mxu0 %v719_v7  ;;  %745 = vmatpush.bf16.msra.mxu2 %v719_v7 }
  0x39   : > { %746 = vmatpush.bf16.msra.mxu3 %v719_v7  ;;  %744 = vmatpush.bf16.msra.mxu1 %v719_v7  ;;  %v433_v7 = vadd.s32 80, %v1064_v17 }
  0x3b   : > { %v447_v24 = vadd.s32 %v1074_v22, %v433_v7 }
  0x3c   : > { %378 = vmatpush.bf16.msra.mxu0 %v718_v8  ;;  %748 = vmatpush.bf16.msra.mxu2 %v718_v8 }
  0x3d   : > { %749 = vmatpush.bf16.msra.mxu3 %v718_v8  ;;  %747 = vmatpush.bf16.msra.mxu1 %v718_v8  ;;  %vm459_vm10 = vcmp.lt.s32.totalorder %v447_v24, 256 }
  0x3f   : > { %379 = vmatmul.bf16.vlgmr.msra.gmra.mxu0 %v712_v9  ;;  %389 = vmatmul.bf16.vlgmr.msra.gmra.mxu2 %v714_v10 }
  0x40   : > { %399 = vmatmul.bf16.vlgmr.msra.gmra.mxu3 %v716_v11  ;;  %384 = vmatmul.bf16.vlgmr.msra.gmra.mxu1 %v713_v12 }
  0x4f   : > { %394 = vmatmul.bf16.gmra.mxu2 %v715_v13 }
  0x50   : > { %404 = vmatmul.bf16.gmra.mxu3 %v717_v14  ;;  %v446_v14 = vadd.s32 %v1074_v22, %v432_v1 }
  0x52   : > { %vm458_vm9 = vcmp.lt.s32.totalorder %v446_v14, 256 }
  0xbc   : > { %v380_v16 = vpop.f32.mrf.mxu0 }
  0xbd   : > { %v385_v18 = vpop.f32.mrf.mxu1  ;;  %v381_v21 = vadd.f32 %v1071_v20, %v380_v16  ;;  %v434_v16 = vadd.s32 88, %v1064_v17 }
  0xbe   : > { %v386_v30 = vadd.f32 %v1071_v20, %v385_v18 }
  0xbf   : > { %v410_v29 = vmax.f32 %v381_v21, 0.0 }
  0xc0   : > { %v412_v37 = vmax.f32 %v386_v30, 0.0 }
  0xc1   : > { %v485_v36 = vsel %vm449_vm0, %v410_v29, 0.0  ;;  %v448_v29 = vadd.s32 %v1074_v22, %v434_v16 }
  0xc2   : > { %v390_v25 = vpop.f32.mrf.mxu2  ;;  %v487_v45 = vsel %vm451_vm2, %v412_v37, 0.0 }
  0xc3   : > { %v400_v27 = vpop.f32.mrf.mxu3  ;;  %v391_v47 = vadd.f32 %v1071_v20, %v390_v25  ;;  %vm460_vm11 = vcmp.lt.s32.totalorder %v448_v29, 256 }
  0xc4   : > { %v382_v28 = vpop.f32.mrf.mxu0  ;;  %v401_v5 = vadd.f32 %v1071_v20, %v400_v27 }
  0xc5   : > { %v383_v31 = vadd.f32 %v1071_v20, %v382_v28  ;;  %v387_v33 = vpop.f32.mrf.mxu1  ;;  %v414_v54 = vmax.f32 %v391_v47, 0.0 }
  0xc6   : > { %v388_v39 = vadd.f32 %v1071_v20, %v387_v33  ;;  %v418_v18 = vmax.f32 %v401_v5, 0.0 }
  0xc7   : > { %v411_v35 = vmax.f32 %v383_v31, 0.0  ;;  %v489_v63 = vsel %vm453_vm4, %v414_v54, 0.0 }
  0xc8   : > { %v413_v46 = vmax.f32 %v388_v39, 0.0  ;;  %v493_v30 = vsel %vm457_vm8, %v418_v18, 0.0 }
  0xc9   : > { %v486_v38 = vsel %vm450_vm1, %v411_v35, 0.0 }
  0xca   : > { %v392_v41 = vpop.f32.mrf.mxu2  ;;  %v498_v44 = vadd.f32 %v486_v38, %v485_v36  ;;  %v488_v52 = vsel %vm452_vm3, %v413_v46, 0.0 }
  0xcb   : > { %v402_v43 = vpop.f32.mrf.mxu3  ;;  %v393_v55 = vadd.f32 %v1071_v20, %v392_v41 }
  0xcc   : > { %v499_v49 = vadd.f32 %v498_v44, %v487_v45  ;;  %v403_v10 = vadd.f32 %v1071_v20, %v402_v43  ;;  %v497_v43 = vld [vmem:[#allocation2] sm:$0x1] }
  0xcd   : > { %v415_v0 = vmax.f32 %v393_v55, 0.0 }
  0xce   : > { %v500_v58 = vadd.f32 %v499_v49, %v488_v52  ;;  %v419_v25 = vmax.f32 %v403_v10, 0.0 }
  0xcf   : > { %v490_v9 = vsel %vm454_vm5, %v415_v0, 0.0 }
  0xd0   : > { %v501_v3 = vadd.f32 %v500_v58, %v489_v63  ;;  %v494_v32 = vsel %vm458_vm9, %v419_v25, 0.0 }
  0xd2   : > { %v395_v53 = vpop.f32.mrf.mxu2  ;;  %v502_v13 = vadd.f32 %v501_v3, %v490_v9 }
  0xd3   : > { %v396_v56 = vadd.f32 %v1071_v20, %v395_v53  ;;  %v405_v57 = vpop.f32.mrf.mxu3 }
  0xd4   : > { %v406_v19 = vadd.f32 %v1071_v20, %v405_v57 }
  0xd5   : > { %v416_v2 = vmax.f32 %v396_v56, 0.0 }
  0xd6   : > { %v420_v31 = vmax.f32 %v406_v19, 0.0 }
  0xd7   : > { %v491_v11 = vsel %vm455_vm6, %v416_v2, 0.0 }
  0xd8   : > { %v503_v23 = vadd.f32 %v502_v13, %v491_v11  ;;  %v495_v35 = vsel %vm459_vm10, %v420_v31, 0.0 }
  0xda   : > { %v397_v8 = vpop.f32.mrf.mxu2 }
  0xdb   : > { %v398_v12 = vadd.f32 %v1071_v20, %v397_v8  ;;  %v407_v15 = vpop.f32.mrf.mxu3 }
  0xdc   : > { %v408_v27 = vadd.f32 %v1071_v20, %v407_v15 }
  0xdd   : > { %v417_v21 = vmax.f32 %v398_v12, 0.0 }
  0xde   : > { %v421_v33 = vmax.f32 %v408_v27, 0.0 }
  0xdf   : > { %v492_v26 = vsel %vm456_vm7, %v417_v21, 0.0 }
  0xe0   : > { %v504_v28 = vadd.f32 %v503_v23, %v492_v26  ;;  %v496_v37 = vsel %vm460_vm11, %v421_v33, 0.0 }
  0xe2   : > { %v505_v17 = vadd.f32 %v504_v28, %v493_v30 }
  0xe4   : > { %v506_v34 = vadd.f32 %v505_v17, %v494_v32 }
  0xe6   : > { %v507_v36 = vadd.f32 %v506_v34, %v495_v35 }
  0xe8   : > { %v508_v38 = vadd.f32 %v507_v36, %v496_v37 }
  0xea   : > { %v509_v39 = vrot.slane %v508_v38, 4 }
  0xec   : > { %v510_v40 = vadd.f32 %v509_v39, %v508_v38 }
  0xee   : > { %v511_v41 = vrot.slane %v510_v40, 2 }
  0xf0   : > { %v512_v20 = vadd.f32 %v511_v41, %v510_v40 }
  0xf2   : > { %v513_v42 = vrot.slane %v512_v20, 1 }
  0xf4   : > { %v514_v44 = vadd.f32 %v513_v42, %v512_v20  ;;  %520 = sbr.rel (%p709_p1) target bundleno = 410 (0x19a), region = 48 }
  0xf6   : > { %v515_v22 = vadd.f32 %v514_v44, %v497_v43 }
  0xf8   : > { %516 = vst [vmem:[#allocation2] sm:$0x1] %v515_v22 }
  0xf9   : > { %v538_v45 = vld [vmem:[%s1211_s3 + $0x78] sm:$0xff]  ;;  %v537_v46 = vld [vmem:[%s1211_s3 + $0x70] sm:$0xff]  ;;  %v536_v47 = vld [vmem:[%s1211_s3 + $0x68] sm:$0xff] }
  0xfa   : > { %540 = vmatpush.msra.mxu0 %v538_v45  ;;  %v535_v48 = vld [vmem:[%s1211_s3 + $0x60] sm:$0xff]  ;;  %v534_v49 = vld [vmem:[%s1211_s3 + $0x58] sm:$0xff]  ;;  %v533_v50 = vld [vmem:[%s1211_s3 + $0x50] sm:$0xff] }
  0xfb   : > { %v532_v51 = vld [vmem:[%s1211_s3 + $0x48] sm:$0xff]  ;;  %v531_v52 = vld [vmem:[%s1211_s3 + $0x40] sm:$0xff]  ;;  %v530_v53 = vld [vmem:[%s1211_s3 + $0x38] sm:$0xff] }
  0xfc   : > { %541 = vmatpush.msra.mxu0 %v537_v46  ;;  %v529_v54 = vld [vmem:[%s1211_s3 + $0x30] sm:$0xff]  ;;  %v528_v55 = vld [vmem:[%s1211_s3 + $0x28] sm:$0xff]  ;;  %v527_v56 = vld [vmem:[%s1211_s3 + $0x20] sm:$0xff] }
  0xfd   : > { %v526_v57 = vld [vmem:[%s1211_s3 + $0x18] sm:$0xff]  ;;  %v525_v58 = vld [vmem:[%s1211_s3 + $0x10] sm:$0xff]  ;;  %v524_v60 = vld [vmem:[%s1211_s3 + $0x8] sm:$0xff] }
  0xfe   : > { %542 = vmatpush.msra.mxu0 %v536_v47  ;;  %v523_v61 = vld [vmem:[%s1211_s3] sm:$0xff] }
  0xff   : > { %v521_v59 = vld [vmem:[#allocation2] sm:$0x1] }
 0x100   : > { %543 = vmatpush.msra.mxu0 %v535_v48  ;;  %v522_v62 = vmul.f32 0.00390625, %v521_v59  ;;  %v539_v63 = vld [vmem:[%s1212_s4] sm:$0x1] }
 0x102   : > { %544 = vmatpush.msra.mxu0 %v534_v49 }
 0x104   : > { %545 = vmatpush.msra.mxu0 %v533_v50 }
 0x106   : > { %546 = vmatpush.msra.mxu0 %v532_v51 }
 0x108   : > { %547 = vmatpush.msra.mxu0 %v531_v52 }
 0x10a   : > { %548 = vmatpush.msra.mxu0 %v530_v53 }
 0x10c   : > { %549 = vmatpush.msra.mxu0 %v529_v54 }
 0x10e   : > { %550 = vmatpush.msra.mxu0 %v528_v55 }
 0x110   : > { %551 = vmatpush.msra.mxu0 %v527_v56 }
 0x112   : > { %552 = vmatpush.msra.mxu0 %v526_v57 }
 0x114   : > { %553 = vmatpush.msra.mxu0 %v525_v58 }
 0x116   : > { %554 = vmatpush.msra.mxu0 %v524_v60 }
 0x118   : > { %555 = vmatpush.msra.mxu0 %v523_v61 }
 0x119   : > { %556 = vmatmul.f32.vlgmr.msra.gmra.mxu0 %v522_v62 }
 0x196   : > { %v557_v0 = vpop.f32.mrf.mxu0 }
 0x197   : > { %v558_v1 = vadd.f32 %v557_v0, %v539_v63 }
 0x199   : > { %560 = vst [vmem:[%s1031_s27] sm:$0x1] %v558_v1 }
 0x19a PF: > { %s570_s12 = scalar_lea.hbm %s1213_s5, %s906_s22  ;;  %s572_s13 = sshll.u32 %s1031_s27, 4  ;;  %s573_s13 = int_to_ptr.vmem [resolvable:$true] %s572_s13 }
 0x19b   : > { %s574_s14 = sshll.u32 %s570_s12, 4  ;;  %s562_s15 = scalar_lea.sflag [#allocation4], %s238_s10  ;;  %s575_s14 = int_to_ptr.hbm [resolvable:$true] %s574_s14 }
 0x19c   : > { %s838_s16 = sshra.s32 %s575_s14, 4  ;;  %s844_s26 = scalar_lea.hbm %s1213_s5, 2  ;;  %s839_s16 = int_to_ptr.hbm [resolvable:$true] %s838_s16 }
 0x19d   : > { %s840_s21 = scalar_lea.hbm %s839_s16, 1  ;;  %p845_p6 = scmp.lt.s32.totalorder %s839_s16, %s1213_s5 }
 0x19e   : > { %p841_p2 = scmp.ne.s32.totalorder %s839_s16, %s840_s21  ;;  %p846_p7 = scmp.lt.s32.totalorder %s844_s26, %s840_s21 }
 0x1a0   : > { %p842_p4 = pnand %p841_p2, %p1000_p3  ;;  %p847_p8 = por %p846_p7, %p845_p6 }
 0x1a2   : > { %p843_p5 = pneg %p842_p4 }
 0x1a4   : > { %p848_p10 = pnand %p847_p8, %p843_p5 }
 0x1a6   : > { %851 = shalt.err (!%p848_p10)
}
 0x1a7   : > { %751 = dma.vmem_to_hbm [thread:$0]  (%p1000_p3), %s573_s13, 16, %s575_s14, %s562_s15  }
 0x1a8 PF: > { %p757_p11 = scmp.ge.s32.totalorder %s918_s25, 2  ;;  %s586_s22 = sand.u32 1, %s890_s18  }
 0x1a9   : > { %s587_s10 = scalar_lea.sflag [#allocation4], %s586_s22 }
 0x1aa   : > { %p754_p12 = pnand %p757_p11, %p1010_p9 }
 0x1ac   : > { %p755_p13 = pneg %p754_p12 }
 0x1ae   : > { %885 = dma.done.wait (%p755_p13), %s587_s10, 16  }
 0x1af   : > { %887 = vsyncadd (%p755_p13), %s587_s10, 4294967280  ;;  %s18_s25 = sadd.s32 1, %s918_s25   ;;  %s1216_s18 = smov %s894_s19 }
 0x1b0   : > { %p15_p0 = scmp.ge.s32.totalorder %s18_s25, 8   ;;  %s1217_s19 = smov %s898_s20 }
 0x1b1   : > { %s1218_s20 = smov %s1018_s9  ;;  %s1219_s21 = smov %s910_s23 }
 0x1b2   : > { %s1220_s22 = smov %s914_s24  ;;  %s1221_s23 = smov %s1224_s28 }
 0x1b3   : > { %s1222_s24 = smov %s1228_s29  ;;  %17 = sbr.rel (!%p15_p0) target bundleno = 5 (0x5), region = 83 }
 0x1b8   :  { %592 = vsyncpa [#allocation4], 1 }
 0x1b9   :  { %594 = vsyncpa [#allocation4 + $0x1], 1 }

</bundles_post_ra>
